<compile_context>
chip_gen: v7x
topology: tpu7x:2x2x1
jax: 0.10.0
libtpu: 0.0.40
codegen_flags: <defaults>
</compile_context>

<pallas_src>
import functools

import jax
import jax.numpy as jnp
import numpy as np
from jax import lax
from jax.experimental import pallas as pl
from jax.experimental.pallas import tpu as pltpu

NEG_SLOPE = 0.2    # DGL GATConv default negative_slope
NEG_BIG = -1e9     # finite additive mask; exp(x + NEG_BIG - m) underflows to 0


def _gat_layer(h, bias_e, wcat_ref, wlT_ref, b_ref, num_heads, out_feats):
    """One GATConv layer (whole small graph resident in VMEM).

    h:      (N, Din) f32
    bias_e: (N, N) f32 additive mask, 0 on edges / NEG_BIG elsewhere, [dst, src]
    wcat:   (Din, H*F + H) = [W | W_h @ a_r_h]  -> z and destination scores
    wlT:    (H, Din)       = (W_h @ a_l_h)^T    -> source scores for all heads
    Returns (N, H*F) f32 (heads concatenated, DGL order) + bias.
    """
    hf = num_heads * out_feats
    # Projection + destination scores in ONE MXU matmul.
    zcat = jnp.dot(h, wcat_ref[...], preferred_element_type=jnp.float32)
    z = zcat[:, :hf]                                   # (N, H*F)
    er = zcat[:, hf:hf + num_heads]                    # (N, H)  dest scores
    # Source scores for all heads at once: (H, Din) x (N, Din) -> (H, N).
    elT = lax.dot_general(wlT_ref[...], h, (((1,), (1,)), ((), ())),
                          preferred_element_type=jnp.float32)

    outs = []
    for hd in range(num_heads):                        # static unroll (H = 4 / 1)
        e = er[:, hd:hd + 1] + elT[hd:hd + 1, :]       # (Ndst, Nsrc)
        e = jnp.where(e > 0, e, NEG_SLOPE * e)         # LeakyReLU(0.2)
        e = e + bias_e                                 # mask non-edges (additive)
        m = jnp.max(e, axis=-1, keepdims=True)
        p = jnp.exp(e - m)                             # masked entries -> exactly 0
        denom = jnp.sum(p, axis=-1, keepdims=True)     # >= 1 when the row has an edge
        alpha = p * pl.reciprocal(denom, approx=True)  # (N, N) edge softmax
        zh = z[:, hd * out_feats:(hd + 1) * out_feats]
        outs.append(jnp.dot(alpha, zh, preferred_element_type=jnp.float32))
    rst = outs[0] if num_heads == 1 else jnp.concatenate(outs, axis=-1)
    return rst + b_ref[...]


def gat_kernel(adj_ref, h_ref, w1_ref, wl1_ref, b1_ref,
               w2_ref, wl2_ref, b2_ref, out_ref, *, heads1, hid, out_dim):
    h = h_ref[0]                                       # (N, in_dim)
    adj = adj_ref[0].astype(jnp.float32)               # (N, N), adj[dst, src]
    bias_e = jnp.where(adj > 0.0, 0.0, NEG_BIG)        # hoisted, shared by both layers

    # F.dropout(..., training=False) == identity for both dropout calls.
    h1 = _gat_layer(h, bias_e, w1_ref, wl1_ref, b1_ref, heads1, hid)
    h1 = jnp.maximum(h1, 0.0)                          # .flatten(1) is the concat; relu
    h2 = _gat_layer(h1, bias_e, w2_ref, wl2_ref, b2_ref, 1, out_dim)

    # .mean(1) over a single head == identity. Final softmax over features.
    m = jnp.max(h2, axis=-1, keepdims=True)
    e = jnp.exp(h2 - m)
    s = jnp.sum(e, axis=-1, keepdims=True)
    out_ref[0] = e * pl.reciprocal(s, approx=True)


def _fold_layer_params(w, al, ar):
    """Fold the attention vectors into the projection weights (wrapper side)."""
    din = w.shape[0]
    num_heads, out_feats = al.shape
    w3 = w.reshape(din, num_heads, out_feats)
    wr = jnp.einsum('dhf,hf->dh', w3, ar)              # (Din, H): dest-score weights
    wcat = jnp.concatenate([w, wr], axis=1)            # (Din, H*F + H)
    wlT = jnp.einsum('dhf,hf->hd', w3, al)             # (H, Din): source-score weights
    return wcat, wlT


def gat_forward(h, adj_int8, params, *, heads1, hid, out_dim):
    """h: (B, N, in_dim) f32; adj_int8: (B, N, N) int8 with adj[b, dst, src]."""
    w1, al1, ar1, b1, w2, al2, ar2, b2 = params
    wcat1, wlT1 = _fold_layer_params(w1, al1, ar1)
    wcat2, wlT2 = _fold_layer_params(w2, al2, ar2)

    B, N, in_dim = h.shape
    kernel = functools.partial(gat_kernel, heads1=heads1, hid=hid, out_dim=out_dim)
    full2d = lambda arr: pl.BlockSpec(arr.shape, lambda b: (0, 0))  # broadcast weights

    return pl.pallas_call(
        kernel,
        grid=(B,),
        out_shape=jax.ShapeDtypeStruct((B, N, out_dim), jnp.float32),
        in_specs=[
            pl.BlockSpec((1, N, N), lambda b: (b, 0, 0)),       # adjacency (int8)
            pl.BlockSpec((1, N, in_dim), lambda b: (b, 0, 0)),  # node features
            full2d(wcat1), full2d(wlT1), full2d(b1),
            full2d(wcat2), full2d(wlT2), full2d(b2),
        ],
        out_specs=pl.BlockSpec((1, N, out_dim), lambda b: (b, 0, 0)),
        compiler_params=pltpu.CompilerParams(
            dimension_semantics=("parallel",),                  # graphs are independent
            vmem_limit_bytes=32 * 1024 * 1024,
        ),
    )(adj_int8, h, wcat1, wlT1, b1, wcat2, wlT2, b2)


# ---------------- pure-JAX reference (same math, for sanity check) -----------
def _ref_layer(h, adj, w, al, ar, b, num_heads, out_feats):
    z = h @ w
    mask = adj > 0
    outs = []
    for hd in range(num_heads):
        zh = z[:, hd * out_feats:(hd + 1) * out_feats]
        er = zh @ ar[hd][:, None]
        el = (al[hd][None, :] @ zh.T)
        e = er + el
        e = jnp.where(e > 0, e, NEG_SLOPE * e)
        e = jnp.where(mask, e, -1e30)
        p = jnp.where(mask, jnp.exp(e - e.max(-1, keepdims=True)), 0.0)
        alpha = p / p.sum(-1, keepdims=True)
        outs.append(alpha @ zh)
    return jnp.concatenate(outs, -1) + b


def _ref_forward(h, adj, params, heads1, hid, out_dim):
    w1, al1, ar1, b1, w2, al2, ar2, b2 = params
    h1 = jnp.maximum(_ref_layer(h, adj, w1, al1, ar1, b1, heads1, hid), 0.0)
    h2 = _ref_layer(h1, adj, w2, al2, ar2, b2, 1, out_dim)
    return jax.nn.softmax(h2, axis=1)


if __name__ == "__main__":
    B, N, in_dim, hid, heads1, out_dim = 4, 16, 8, 8, 4, 4
    dropout = 0.5  # inference mode -> identity

    key = jax.random.PRNGKey(0)
    k_h, k_adj, k_w1, k_a1, k_w2, k_a2 = jax.random.split(key, 6)

    # Node features and random graphs with self-loops (adj[b, dst, src]).
    h = jax.random.normal(k_h, (B, N, in_dim), dtype=jnp.float32)
    adj = (jax.random.uniform(k_adj, (B, N, N)) < 0.3).astype(jnp.float32)
    adj = jnp.maximum(adj, jnp.eye(N, dtype=jnp.float32)[None])
    adj_i8 = adj.astype(jnp.int8)

    def xavier(k, shape, gain=np.sqrt(2.0)):  # DGL GATConv init (xavier_normal, gain=sqrt(2))
        fan_in, fan_out = shape[-2], shape[-1]
        std = gain * np.sqrt(2.0 / (fan_in + fan_out))
        return (jax.random.normal(k, shape) * std).astype(jnp.float32)

    k_a1l, k_a1r = jax.random.split(k_a1)
    k_a2l, k_a2r = jax.random.split(k_a2)
    w1 = xavier(k_w1, (in_dim, heads1 * hid))
    al1 = xavier(k_a1l, (heads1, hid))
    ar1 = xavier(k_a1r, (heads1, hid))
    b1 = jnp.zeros((1, heads1 * hid), jnp.float32)   # DGL bias init: zeros
    w2 = xavier(k_w2, (heads1 * hid, out_dim))
    al2 = xavier(k_a2l, (1, out_dim))
    ar2 = xavier(k_a2r, (1, out_dim))
    b2 = jnp.zeros((1, out_dim), jnp.float32)
    params = (w1, al1, ar1, b1, w2, al2, ar2, b2)

    out = gat_forward(h, adj_i8, params, heads1=heads1, hid=hid, out_dim=out_dim)
    out = jax.block_until_ready(out)

    ref = jax.vmap(
        lambda hh, aa: _ref_forward(hh, aa, params, heads1, hid, out_dim))(h, adj)

    # Tolerances relaxed slightly because the kernel uses the EUP approximate
    # reciprocal for the three softmax normalizations.
    np.testing.assert_allclose(np.asarray(out), np.asarray(ref), rtol=2e-2, atol=5e-3)
    assert out.shape == (B, N, out_dim)
    np.testing.assert_allclose(np.asarray(out).sum(axis=-1), np.ones((B, N)),
                               rtol=0, atol=1e-2)
    print("KERNEL_OK")
</pallas_src>

<mosaic_0001>
module attributes {stable_mosaic.version = 11 : i64} {
  func.func @gat_kernel(%arg0: i32, %arg1: memref<1x16x16xi8, #tpu.memory_space<vmem>>, %arg2: memref<1x16x8xf32, #tpu.memory_space<vmem>>, %arg3: memref<8x36xf32, #tpu.memory_space<vmem>>, %arg4: memref<4x8xf32, #tpu.memory_space<vmem>>, %arg5: memref<1x32xf32, #tpu.memory_space<vmem>>, %arg6: memref<32x5xf32, #tpu.memory_space<vmem>>, %arg7: memref<1x32xf32, #tpu.memory_space<vmem>>, %arg8: memref<1x4xf32, #tpu.memory_space<vmem>>, %arg9: memref<1x16x4xf32, #tpu.memory_space<vmem>>) attributes {dimension_semantics = [#tpu.dimension_semantics<parallel>], iteration_bounds = array<i64: 4>, scalar_prefetch = 0 : i64, scratch_operands = 0 : i64, tpu.core_type = #tpu.core_type<tc>, window_params = [{transform_indices = @transform_0, window_bounds = array<i64: 1, 16, 16>}, {transform_indices = @transform_1, window_bounds = array<i64: 1, 16, 8>}, {pipeline_mode = #tpu.pipeline_mode<synchronous>, transform_indices = @transform_2, window_bounds = array<i64: 8, 36>}, {pipeline_mode = #tpu.pipeline_mode<synchronous>, transform_indices = @transform_3, window_bounds = array<i64: 4, 8>}, {pipeline_mode = #tpu.pipeline_mode<synchronous>, transform_indices = @transform_4, window_bounds = array<i64: 1, 32>}, {pipeline_mode = #tpu.pipeline_mode<synchronous>, transform_indices = @transform_5, window_bounds = array<i64: 32, 5>}, {pipeline_mode = #tpu.pipeline_mode<synchronous>, transform_indices = @transform_6, window_bounds = array<i64: 1, 32>}, {pipeline_mode = #tpu.pipeline_mode<synchronous>, transform_indices = @transform_7, window_bounds = array<i64: 1, 4>}, {transform_indices = @transform_8, window_bounds = array<i64: 1, 16, 4>}]} {
    %c0 = arith.constant 0 : index
    %c0_0 = arith.constant 0 : index
    %c0_1 = arith.constant 0 : index
    %0 = vector.load %arg2[%c0, %c0_0, %c0_1] : memref<1x16x8xf32, #tpu.memory_space<vmem>>, vector<1x16x8xf32>
    %1 = vector.shape_cast %0 : vector<1x16x8xf32> to vector<16x8xf32>
    %c0_2 = arith.constant 0 : index
    %c0_3 = arith.constant 0 : index
    %c0_4 = arith.constant 0 : index
    %2 = vector.load %arg1[%c0_2, %c0_3, %c0_4] : memref<1x16x16xi8, #tpu.memory_space<vmem>>, vector<1x16x16xi8>
    %3 = vector.shape_cast %2 : vector<1x16x16xi8> to vector<16x16xi8>
    %4 = arith.sitofp %3 : vector<16x16xi8> to vector<16x16xf32>
    %cst = arith.constant 0.000000e+00 : f32
    %5 = vector.broadcast %cst : f32 to vector<16x16xf32>
    %6 = arith.cmpf ogt, %4, %5 : vector<16x16xf32>
    %cst_5 = arith.constant 0.000000e+00 : f32
    %cst_6 = arith.constant -1.000000e+09 : f32
    %7 = vector.broadcast %cst_5 : f32 to vector<16x16xf32>
    %8 = vector.broadcast %cst_6 : f32 to vector<16x16xf32>
    %9 = arith.select %6, %7, %8 : vector<16x16xi1>, vector<16x16xf32>
    %c0_7 = arith.constant 0 : index
    %c0_8 = arith.constant 0 : index
    %10 = vector.load %arg3[%c0_7, %c0_8] : memref<8x36xf32, #tpu.memory_space<vmem>>, vector<8x36xf32>
    %cst_9 = arith.constant dense<0.000000e+00> : vector<16x36xf32>
    %11 = tpu.matmul %1, %10, %cst_9 {dimension_numbers = #tpu.dot_dimension_numbers<[1], [0], [0], [1], [0, 0, 1, 1], [], []>} : vector<16x8xf32>, vector<8x36xf32>, vector<16x36xf32> -> vector<16x36xf32>
    %12 = vector.extract_strided_slice %11 {offsets = [0, 0], sizes = [16, 32], strides = [1, 1]} : vector<16x36xf32> to vector<16x32xf32>
    %13 = vector.extract_strided_slice %11 {offsets = [0, 32], sizes = [16, 4], strides = [1, 1]} : vector<16x36xf32> to vector<16x4xf32>
    %c0_10 = arith.constant 0 : index
    %c0_11 = arith.constant 0 : index
    %14 = vector.load %arg4[%c0_10, %c0_11] : memref<4x8xf32, #tpu.memory_space<vmem>>, vector<4x8xf32>
    %cst_12 = arith.constant dense<0.000000e+00> : vector<4x16xf32>
    %15 = tpu.matmul %14, %1, %cst_12 {dimension_numbers = #tpu.dot_dimension_numbers<[1], [1], [0], [0], [0, 0, 1, 0], [], []>} : vector<4x8xf32>, vector<16x8xf32>, vector<4x16xf32> -> vector<4x16xf32>
    %16 = vector.extract_strided_slice %13 {offsets = [0, 0], sizes = [16, 1], strides = [1, 1]} : vector<16x4xf32> to vector<16x1xf32>
    %17 = vector.extract_strided_slice %15 {offsets = [0, 0], sizes = [1, 16], strides = [1, 1]} : vector<4x16xf32> to vector<1x16xf32>
    %18 = vector.broadcast %16 : vector<16x1xf32> to vector<16x16xf32>
    %19 = vector.broadcast %17 : vector<1x16xf32> to vector<16x16xf32>
    %20 = arith.addf %18, %19 : vector<16x16xf32>
    %cst_13 = arith.constant 0.000000e+00 : f32
    %21 = vector.broadcast %cst_13 : f32 to vector<16x16xf32>
    %22 = arith.cmpf ogt, %20, %21 : vector<16x16xf32>
    %cst_14 = arith.constant 2.000000e-01 : f32
    %23 = vector.broadcast %cst_14 : f32 to vector<16x16xf32>
    %24 = arith.mulf %23, %20 : vector<16x16xf32>
    %25 = arith.select %22, %20, %24 : vector<16x16xi1>, vector<16x16xf32>
    %26 = arith.addf %25, %9 : vector<16x16xf32>
    %cst_15 = arith.constant dense<0xFF800000> : vector<16xf32>
    %27 = vector.multi_reduction <maximumf>, %26, %cst_15 [1] : vector<16x16xf32> to vector<16xf32>
    %28 = vector.shape_cast %27 : vector<16xf32> to vector<16x1xf32>
    %29 = vector.broadcast %28 : vector<16x1xf32> to vector<16x16xf32>
    %30 = arith.subf %26, %29 : vector<16x16xf32>
    %31 = math.exp %30 : vector<16x16xf32>
    %cst_16 = arith.constant dense<0.000000e+00> : vector<16xf32>
    %32 = vector.multi_reduction <add>, %31, %cst_16 [1] : vector<16x16xf32> to vector<16xf32>
    %33 = vector.shape_cast %32 : vector<16xf32> to vector<16x1xf32>
    %34 = tpu.reciprocal %33 {approx = true} : vector<16x1xf32> -> vector<16x1xf32>
    %35 = vector.broadcast %34 : vector<16x1xf32> to vector<16x16xf32>
    %36 = arith.mulf %31, %35 : vector<16x16xf32>
    %37 = vector.extract_strided_slice %12 {offsets = [0, 0], sizes = [16, 8], strides = [1, 1]} : vector<16x32xf32> to vector<16x8xf32>
    %cst_17 = arith.constant dense<0.000000e+00> : vector<16x8xf32>
    %38 = tpu.matmul %36, %37, %cst_17 {dimension_numbers = #tpu.dot_dimension_numbers<[1], [0], [0], [1], [0, 0, 1, 1], [], []>} : vector<16x16xf32>, vector<16x8xf32>, vector<16x8xf32> -> vector<16x8xf32>
    %39 = vector.extract_strided_slice %13 {offsets = [0, 1], sizes = [16, 1], strides = [1, 1]} : vector<16x4xf32> to vector<16x1xf32>
    %40 = vector.extract_strided_slice %15 {offsets = [1, 0], sizes = [1, 16], strides = [1, 1]} : vector<4x16xf32> to vector<1x16xf32>
    %41 = vector.broadcast %39 : vector<16x1xf32> to vector<16x16xf32>
    %42 = vector.broadcast %40 : vector<1x16xf32> to vector<16x16xf32>
    %43 = arith.addf %41, %42 : vector<16x16xf32>
    %cst_18 = arith.constant 0.000000e+00 : f32
    %44 = vector.broadcast %cst_18 : f32 to vector<16x16xf32>
    %45 = arith.cmpf ogt, %43, %44 : vector<16x16xf32>
    %cst_19 = arith.constant 2.000000e-01 : f32
    %46 = vector.broadcast %cst_19 : f32 to vector<16x16xf32>
    %47 = arith.mulf %46, %43 : vector<16x16xf32>
    %48 = arith.select %45, %43, %47 : vector<16x16xi1>, vector<16x16xf32>
    %49 = arith.addf %48, %9 : vector<16x16xf32>
    %cst_20 = arith.constant dense<0xFF800000> : vector<16xf32>
    %50 = vector.multi_reduction <maximumf>, %49, %cst_20 [1] : vector<16x16xf32> to vector<16xf32>
    %51 = vector.shape_cast %50 : vector<16xf32> to vector<16x1xf32>
    %52 = vector.broadcast %51 : vector<16x1xf32> to vector<16x16xf32>
    %53 = arith.subf %49, %52 : vector<16x16xf32>
    %54 = math.exp %53 : vector<16x16xf32>
    %cst_21 = arith.constant dense<0.000000e+00> : vector<16xf32>
    %55 = vector.multi_reduction <add>, %54, %cst_21 [1] : vector<16x16xf32> to vector<16xf32>
    %56 = vector.shape_cast %55 : vector<16xf32> to vector<16x1xf32>
    %57 = tpu.reciprocal %56 {approx = true} : vector<16x1xf32> -> vector<16x1xf32>
    %58 = vector.broadcast %57 : vector<16x1xf32> to vector<16x16xf32>
    %59 = arith.mulf %54, %58 : vector<16x16xf32>
    %60 = vector.extract_strided_slice %12 {offsets = [0, 8], sizes = [16, 8], strides = [1, 1]} : vector<16x32xf32> to vector<16x8xf32>
    %cst_22 = arith.constant dense<0.000000e+00> : vector<16x8xf32>
    %61 = tpu.matmul %59, %60, %cst_22 {dimension_numbers = #tpu.dot_dimension_numbers<[1], [0], [0], [1], [0, 0, 1, 1], [], []>} : vector<16x16xf32>, vector<16x8xf32>, vector<16x8xf32> -> vector<16x8xf32>
    %62 = vector.extract_strided_slice %13 {offsets = [0, 2], sizes = [16, 1], strides = [1, 1]} : vector<16x4xf32> to vector<16x1xf32>
    %63 = vector.extract_strided_slice %15 {offsets = [2, 0], sizes = [1, 16], strides = [1, 1]} : vector<4x16xf32> to vector<1x16xf32>
    %64 = vector.broadcast %62 : vector<16x1xf32> to vector<16x16xf32>
    %65 = vector.broadcast %63 : vector<1x16xf32> to vector<16x16xf32>
    %66 = arith.addf %64, %65 : vector<16x16xf32>
    %cst_23 = arith.constant 0.000000e+00 : f32
    %67 = vector.broadcast %cst_23 : f32 to vector<16x16xf32>
    %68 = arith.cmpf ogt, %66, %67 : vector<16x16xf32>
    %cst_24 = arith.constant 2.000000e-01 : f32
    %69 = vector.broadcast %cst_24 : f32 to vector<16x16xf32>
    %70 = arith.mulf %69, %66 : vector<16x16xf32>
    %71 = arith.select %68, %66, %70 : vector<16x16xi1>, vector<16x16xf32>
    %72 = arith.addf %71, %9 : vector<16x16xf32>
    %cst_25 = arith.constant dense<0xFF800000> : vector<16xf32>
    %73 = vector.multi_reduction <maximumf>, %72, %cst_25 [1] : vector<16x16xf32> to vector<16xf32>
    %74 = vector.shape_cast %73 : vector<16xf32> to vector<16x1xf32>
    %75 = vector.broadcast %74 : vector<16x1xf32> to vector<16x16xf32>
    %76 = arith.subf %72, %75 : vector<16x16xf32>
    %77 = math.exp %76 : vector<16x16xf32>
    %cst_26 = arith.constant dense<0.000000e+00> : vector<16xf32>
    %78 = vector.multi_reduction <add>, %77, %cst_26 [1] : vector<16x16xf32> to vector<16xf32>
    %79 = vector.shape_cast %78 : vector<16xf32> to vector<16x1xf32>
    %80 = tpu.reciprocal %79 {approx = true} : vector<16x1xf32> -> vector<16x1xf32>
    %81 = vector.broadcast %80 : vector<16x1xf32> to vector<16x16xf32>
    %82 = arith.mulf %77, %81 : vector<16x16xf32>
    %83 = vector.extract_strided_slice %12 {offsets = [0, 16], sizes = [16, 8], strides = [1, 1]} : vector<16x32xf32> to vector<16x8xf32>
    %cst_27 = arith.constant dense<0.000000e+00> : vector<16x8xf32>
    %84 = tpu.matmul %82, %83, %cst_27 {dimension_numbers = #tpu.dot_dimension_numbers<[1], [0], [0], [1], [0, 0, 1, 1], [], []>} : vector<16x16xf32>, vector<16x8xf32>, vector<16x8xf32> -> vector<16x8xf32>
    %85 = vector.extract_strided_slice %13 {offsets = [0, 3], sizes = [16, 1], strides = [1, 1]} : vector<16x4xf32> to vector<16x1xf32>
    %86 = vector.extract_strided_slice %15 {offsets = [3, 0], sizes = [1, 16], strides = [1, 1]} : vector<4x16xf32> to vector<1x16xf32>
    %87 = vector.broadcast %85 : vector<16x1xf32> to vector<16x16xf32>
    %88 = vector.broadcast %86 : vector<1x16xf32> to vector<16x16xf32>
    %89 = arith.addf %87, %88 : vector<16x16xf32>
    %cst_28 = arith.constant 0.000000e+00 : f32
    %90 = vector.broadcast %cst_28 : f32 to vector<16x16xf32>
    %91 = arith.cmpf ogt, %89, %90 : vector<16x16xf32>
    %cst_29 = arith.constant 2.000000e-01 : f32
    %92 = vector.broadcast %cst_29 : f32 to vector<16x16xf32>
    %93 = arith.mulf %92, %89 : vector<16x16xf32>
    %94 = arith.select %91, %89, %93 : vector<16x16xi1>, vector<16x16xf32>
    %95 = arith.addf %94, %9 : vector<16x16xf32>
    %cst_30 = arith.constant dense<0xFF800000> : vector<16xf32>
    %96 = vector.multi_reduction <maximumf>, %95, %cst_30 [1] : vector<16x16xf32> to vector<16xf32>
    %97 = vector.shape_cast %96 : vector<16xf32> to vector<16x1xf32>
    %98 = vector.broadcast %97 : vector<16x1xf32> to vector<16x16xf32>
    %99 = arith.subf %95, %98 : vector<16x16xf32>
    %100 = math.exp %99 : vector<16x16xf32>
    %cst_31 = arith.constant dense<0.000000e+00> : vector<16xf32>
    %101 = vector.multi_reduction <add>, %100, %cst_31 [1] : vector<16x16xf32> to vector<16xf32>
    %102 = vector.shape_cast %101 : vector<16xf32> to vector<16x1xf32>
    %103 = tpu.reciprocal %102 {approx = true} : vector<16x1xf32> -> vector<16x1xf32>
    %104 = vector.broadcast %103 : vector<16x1xf32> to vector<16x16xf32>
    %105 = arith.mulf %100, %104 : vector<16x16xf32>
    %106 = vector.extract_strided_slice %12 {offsets = [0, 24], sizes = [16, 8], strides = [1, 1]} : vector<16x32xf32> to vector<16x8xf32>
    %cst_32 = arith.constant dense<0.000000e+00> : vector<16x8xf32>
    %107 = tpu.matmul %105, %106, %cst_32 {dimension_numbers = #tpu.dot_dimension_numbers<[1], [0], [0], [1], [0, 0, 1, 1], [], []>} : vector<16x16xf32>, vector<16x8xf32>, vector<16x8xf32> -> vector<16x8xf32>
    %108 = tpu.concatenate %38, %61, %84, %107 in 1 : vector<16x8xf32>, vector<16x8xf32>, vector<16x8xf32>, vector<16x8xf32> -> vector<16x32xf32>
    %c0_33 = arith.constant 0 : index
    %c0_34 = arith.constant 0 : index
    %109 = vector.load %arg5[%c0_33, %c0_34] : memref<1x32xf32, #tpu.memory_space<vmem>>, vector<1x32xf32>
    %110 = vector.broadcast %109 : vector<1x32xf32> to vector<16x32xf32>
    %111 = arith.addf %108, %110 : vector<16x32xf32>
    %cst_35 = arith.constant 0.000000e+00 : f32
    %112 = vector.broadcast %cst_35 : f32 to vector<16x32xf32>
    %113 = arith.maximumf %111, %112 : vector<16x32xf32>
    %c0_36 = arith.constant 0 : index
    %c0_37 = arith.constant 0 : index
    %114 = vector.load %arg6[%c0_36, %c0_37] : memref<32x5xf32, #tpu.memory_space<vmem>>, vector<32x5xf32>
    %cst_38 = arith.constant dense<0.000000e+00> : vector<16x5xf32>
    %115 = tpu.matmul %113, %114, %cst_38 {dimension_numbers = #tpu.dot_dimension_numbers<[1], [0], [0], [1], [0, 0, 1, 1], [], []>} : vector<16x32xf32>, vector<32x5xf32>, vector<16x5xf32> -> vector<16x5xf32>
    %116 = vector.extract_strided_slice %115 {offsets = [0, 0], sizes = [16, 4], strides = [1, 1]} : vector<16x5xf32> to vector<16x4xf32>
    %117 = vector.extract_strided_slice %115 {offsets = [0, 4], sizes = [16, 1], strides = [1, 1]} : vector<16x5xf32> to vector<16x1xf32>
    %c0_39 = arith.constant 0 : index
    %c0_40 = arith.constant 0 : index
    %118 = vector.load %arg7[%c0_39, %c0_40] : memref<1x32xf32, #tpu.memory_space<vmem>>, vector<1x32xf32>
    %cst_41 = arith.constant dense<0.000000e+00> : vector<1x16xf32>
    %119 = tpu.matmul %118, %113, %cst_41 {dimension_numbers = #tpu.dot_dimension_numbers<[1], [1], [0], [0], [0, 0, 1, 0], [], []>} : vector<1x32xf32>, vector<16x32xf32>, vector<1x16xf32> -> vector<1x16xf32>
    %120 = vector.broadcast %117 : vector<16x1xf32> to vector<16x16xf32>
    %121 = vector.broadcast %119 : vector<1x16xf32> to vector<16x16xf32>
    %122 = arith.addf %120, %121 : vector<16x16xf32>
    %cst_42 = arith.constant 0.000000e+00 : f32
    %123 = vector.broadcast %cst_42 : f32 to vector<16x16xf32>
    %124 = arith.cmpf ogt, %122, %123 : vector<16x16xf32>
    %cst_43 = arith.constant 2.000000e-01 : f32
    %125 = vector.broadcast %cst_43 : f32 to vector<16x16xf32>
    %126 = arith.mulf %125, %122 : vector<16x16xf32>
    %127 = arith.select %124, %122, %126 : vector<16x16xi1>, vector<16x16xf32>
    %128 = arith.addf %127, %9 : vector<16x16xf32>
    %cst_44 = arith.constant dense<0xFF800000> : vector<16xf32>
    %129 = vector.multi_reduction <maximumf>, %128, %cst_44 [1] : vector<16x16xf32> to vector<16xf32>
    %130 = vector.shape_cast %129 : vector<16xf32> to vector<16x1xf32>
    %131 = vector.broadcast %130 : vector<16x1xf32> to vector<16x16xf32>
    %132 = arith.subf %128, %131 : vector<16x16xf32>
    %133 = math.exp %132 : vector<16x16xf32>
    %cst_45 = arith.constant dense<0.000000e+00> : vector<16xf32>
    %134 = vector.multi_reduction <add>, %133, %cst_45 [1] : vector<16x16xf32> to vector<16xf32>
    %135 = vector.shape_cast %134 : vector<16xf32> to vector<16x1xf32>
    %136 = tpu.reciprocal %135 {approx = true} : vector<16x1xf32> -> vector<16x1xf32>
    %137 = vector.broadcast %136 : vector<16x1xf32> to vector<16x16xf32>
    %138 = arith.mulf %133, %137 : vector<16x16xf32>
    %cst_46 = arith.constant dense<0.000000e+00> : vector<16x4xf32>
    %139 = tpu.matmul %138, %116, %cst_46 {dimension_numbers = #tpu.dot_dimension_numbers<[1], [0], [0], [1], [0, 0, 1, 1], [], []>} : vector<16x16xf32>, vector<16x4xf32>, vector<16x4xf32> -> vector<16x4xf32>
    %c0_47 = arith.constant 0 : index
    %c0_48 = arith.constant 0 : index
    %140 = vector.load %arg8[%c0_47, %c0_48] : memref<1x4xf32, #tpu.memory_space<vmem>>, vector<1x4xf32>
    %141 = vector.broadcast %140 : vector<1x4xf32> to vector<16x4xf32>
    %142 = arith.addf %139, %141 : vector<16x4xf32>
    %cst_49 = arith.constant dense<0xFF800000> : vector<16xf32>
    %143 = vector.multi_reduction <maximumf>, %142, %cst_49 [1] : vector<16x4xf32> to vector<16xf32>
    %144 = vector.shape_cast %143 : vector<16xf32> to vector<16x1xf32>
    %145 = vector.broadcast %144 : vector<16x1xf32> to vector<16x4xf32>
    %146 = arith.subf %142, %145 : vector<16x4xf32>
    %147 = math.exp %146 : vector<16x4xf32>
    %cst_50 = arith.constant dense<0.000000e+00> : vector<16xf32>
    %148 = vector.multi_reduction <add>, %147, %cst_50 [1] : vector<16x4xf32> to vector<16xf32>
    %149 = vector.shape_cast %148 : vector<16xf32> to vector<16x1xf32>
    %150 = tpu.reciprocal %149 {approx = true} : vector<16x1xf32> -> vector<16x1xf32>
    %151 = vector.broadcast %150 : vector<16x1xf32> to vector<16x4xf32>
    %152 = arith.mulf %147, %151 : vector<16x4xf32>
    %c0_51 = arith.constant 0 : index
    %c0_52 = arith.constant 0 : index
    %c0_53 = arith.constant 0 : index
    %153 = vector.load %arg9[%c0_51, %c0_52, %c0_53] : memref<1x16x4xf32, #tpu.memory_space<vmem>>, vector<1x16x4xf32>
    %154 = vector.shape_cast %153 : vector<1x16x4xf32> to vector<16x4xf32>
    %155 = vector.shape_cast %152 : vector<16x4xf32> to vector<1x16x4xf32>
    tpu.vector_store %arg9[%c0_51, %c0_52, %c0_53], %155 {strides = array<i32>} : memref<1x16x4xf32, #tpu.memory_space<vmem>>, vector<1x16x4xf32>,
    return
  }
  func.func @transform_0(%arg0: i32) -> (i32, i32, i32) {
    %c0_i32 = arith.constant 0 : i32
    %c0_i32_0 = arith.constant 0 : i32
    %c0_i32_1 = arith.constant 0 : i32
    return %arg0, %c0_i32, %c0_i32_0 : i32, i32, i32
  }
  func.func @transform_1(%arg0: i32) -> (i32, i32, i32) {
    %c0_i32 = arith.constant 0 : i32
    %c0_i32_0 = arith.constant 0 : i32
    %c0_i32_1 = arith.constant 0 : i32
    return %arg0, %c0_i32, %c0_i32_0 : i32, i32, i32
  }
  func.func @transform_2(%arg0: i32) -> (i32, i32) {
    %c0_i32 = arith.constant 0 : i32
    %c0_i32_0 = arith.constant 0 : i32
    %c0_i32_1 = arith.constant 0 : i32
    return %c0_i32, %c0_i32_0 : i32, i32
  }
  func.func @transform_3(%arg0: i32) -> (i32, i32) {
    %c0_i32 = arith.constant 0 : i32
    %c0_i32_0 = arith.constant 0 : i32
    %c0_i32_1 = arith.constant 0 : i32
    return %c0_i32, %c0_i32_0 : i32, i32
  }
  func.func @transform_4(%arg0: i32) -> (i32, i32) {
    %c0_i32 = arith.constant 0 : i32
    %c0_i32_0 = arith.constant 0 : i32
    %c0_i32_1 = arith.constant 0 : i32
    return %c0_i32, %c0_i32_0 : i32, i32
  }
  func.func @transform_5(%arg0: i32) -> (i32, i32) {
    %c0_i32 = arith.constant 0 : i32
    %c0_i32_0 = arith.constant 0 : i32
    %c0_i32_1 = arith.constant 0 : i32
    return %c0_i32, %c0_i32_0 : i32, i32
  }
  func.func @transform_6(%arg0: i32) -> (i32, i32) {
    %c0_i32 = arith.constant 0 : i32
    %c0_i32_0 = arith.constant 0 : i32
    %c0_i32_1 = arith.constant 0 : i32
    return %c0_i32, %c0_i32_0 : i32, i32
  }
  func.func @transform_7(%arg0: i32) -> (i32, i32) {
    %c0_i32 = arith.constant 0 : i32
    %c0_i32_0 = arith.constant 0 : i32
    %c0_i32_1 = arith.constant 0 : i32
    return %c0_i32, %c0_i32_0 : i32, i32
  }
  func.func @transform_8(%arg0: i32) -> (i32, i32, i32) {
    %c0_i32 = arith.constant 0 : i32
    %c0_i32_0 = arith.constant 0 : i32
    %c0_i32_1 = arith.constant 0 : i32
    return %arg0, %c0_i32, %c0_i32_0 : i32, i32, i32
  }
}

</mosaic_0001>

<bundles_post_ra>
// kernel: tpu_custom_call.1
= control target key start
LH: loop header
LB: loop body
LE: loop exit
PB: predicated region body
PF: predicated region fallthrough
CT: control target
= control target key end

     0   :  { %s1785_s27 = smov 0   ;;  %s1938_s0 = inlined_call_operand.vmem [shape: s8[4,16,16], index: 0, kind: input, shape index: {}]   ;;  %s1939_s1 = inlined_call_operand.vmem [shape: f32[4,16,8], index: 1, kind: input, shape index: {}]   ;;  %s1940_s2 = inlined_call_operand.vmem [shape: f32[8,36], index: 2, kind: input, shape index: {}]   ;;  %s1941_s3 = inlined_call_operand.vmem [shape: f32[4,8], index: 3, kind: input, shape index: {}]   ;;  %s1942_s4 = inlined_call_operand.vmem [shape: f32[1,32], index: 4, kind: input, shape index: {}]   ;;  %s1943_s5 = inlined_call_operand.vmem [shape: f32[32,5], index: 5, kind: input, shape index: {}]   ;;  %s1944_s6 = inlined_call_operand.vmem [shape: f32[1,32], index: 6, kind: input, shape index: {}]   ;;  %s1945_s7 = inlined_call_operand.vmem [shape: f32[1,4], index: 7, kind: input, shape index: {}]   ;;  %s1946_s8 = inlined_call_operand.vmem [shape: f32[4,16,4], index: 8, kind: output, shape index: {}]  }
   0x1 LB: > { %s1444_s28 = sadd.s32 4294967295, %s1723_s27   ;;  %p1448_p0 = scmp.ge.s32.totalorder %s1723_s27, 1  ;;  %s1723_s27 = sphi %s1785_s27, %s18_s27  }
   0x2   : > { %p272_p1 = scmp.lt.s32.totalorder %s1723_s27, 5 }
   0x4   : > { %p273_p2 = pnand %p1448_p0, %p272_p1 }
   0x5   : > { %v338_v0 = vld [vmem:[%s1940_s2] sm:$0xff] (!%p273_p2)  ;;  %p311_p3 = scmp.lt.s32.totalorder (!%p273_p2), %s1444_s28, 3  ;;  %v1725_v1 = vmov (!%p273_p2), 0.0|0.0   ;;  %vm1726_vm0 = vmmov (!%p273_p2), 0   ;;  %v1727_v2 = vmov (!%p273_p2), 0.0   ;;  %v1728_v3 = vmov (!%p273_p2), 33  }
   0x6   : > { %276 = sbr.rel (%p273_p2) target bundleno = 2230 (0x8b6), region = 52  ;;  %1521 = vmatprep.subr.mxu0 (!%p273_p2), %v338_v0  ;;  %1586 = vmatprep.subr.bf16.mxu1 (!%p273_p2), %v1725_v1  ;;  %v1729_v4 = vmov (!%p273_p2), 32   ;;  %vm339_vm1 = vcmask (!%p273_p2), 64512   ;;  %v421_v8 = vld [vmem:[%s1941_s3] sm:$0xf] (!%p273_p2)  ;;  %v1730_v13 = vmov (!%p273_p2), 34   ;;  %v505_v17 = vlaneseq (!%p273_p2) }
   0x7   : > { %1522 = vmatpush3.msra.mxu0 (!%p273_p2), %v338_v0  ;;  %1530 = vmatprep.mubr.msk.f32.mxu1 (!%p273_p2), %vm1726_vm0, %v1727_v2  ;;  %vm1588_vm2 = vmpackc.low (!%p273_p2), %vm339_vm1, %vm339_vm1  ;;  %v1731_v16 = vmov (!%p273_p2), 35   ;;  %v1732_v34 = vmov (!%p273_p2), -1e+09   ;;  %vm519_vm7 = vcmask (!%p273_p2), 130048   ;;  %s1733_s19 = smov (!%p273_p2), 120   ;;  %s1734_s20 = smov (!%p273_p2), 104  }
   0x8   : > { %1646 = vset.pattern.permute.xlu1 (!%p273_p2), %v1728_v3  ;;  %1645 = vset.pattern.permute.xlu0 (!%p273_p2), %v1729_v4  ;;  %v1823_v19 = vshrl.u32 (!%p273_p2), %v505_v17, 7  ;;  %s1735_s21 = smov (!%p273_p2), 112   ;;  %s1736_s11 = smov (!%p273_p2), 16   ;;  %vm1044_vm14 = vcmask (!%p273_p2), 195584   ;;  %vm1062_vm15 = vcmask (!%p273_p2), 261120  }
   0x9   : > { %s1738_s13 = smov (!%p273_p2), 24  }
   0xa   : > { %v633_v21 = vsub.s32 (!%p273_p2), 1, %v1823_v19  ;;  %v507_v22 = vsub.s32 (!%p273_p2), 0, %v1823_v19  ;;  %v764_v27 = vsub.s32 (!%p273_p2), 2, %v1823_v19  ;;  %v895_v52 = vsub.s32 (!%p273_p2), 3, %v1823_v19 }
   0xd   : > { %s1948_s28 = smov (!%p311_p3, %s1444_s28), 3 }
   0xe   : > { %s1480_s9 = sshll.u32 %s1948_s28, 4  ;;  %s1479_s15 = sshll.u32 %s1948_s28, 2 }
   0xf   : > { %s320_s12 = scalar_lea.vmem %s1939_s1, %s1480_s9  ;;  %s315_s18 = scalar_lea.vmem %s1938_s0, %s1479_s15 }
  0x10   : > { %v326_v5 = vld [vmem:[%s320_s12] sm:$0xff]  ;;  %v327_v6 = vld [vmem:[%s320_s12 + $0x8] sm:$0xff]  ;;  %s1737_s12 = smov 8   ;;  %s325_s22 = scalar_lea.vmem %s1946_s8, %s1480_s9 }
  0x11   : > { %1523 = vmatprep.mubr.msk.f32.mxu0 %vm339_vm1, %v326_v5  ;;  %v1587_v7 = vpack.c.bf16 %v327_v6, %v326_v5  ;;  %v1483_v18 = vld [vmem:[%s315_s18] sm:$0xf]  }
  0x12   : > { %1524 = vmatmul.mubr.msk.f32.vlgmr.msra.gmra.mrb[0].mxu0 %vm339_vm1, %v327_v6  ;;  %v1485_v20 = vunpack.c.1.s8 %v1483_v18  ;;  %v1484_v24 = vunpack.c.0.s8 %v1483_v18 }
  0x13   : > { %1589 = vmatpush3.bf16.xpose.msk.msra.mxu1 %vm1588_vm2, %v1587_v7 }
  0x14   : > { %v333_v23 = vcvt.s32.f32 %v1485_v20  ;;  %v332_v28 = vcvt.s32.f32 %v1484_v24 }
  0x16   : > { %vm335_vm3 = vcmp.gt.f32.partialorder %v333_v23, 0.0  ;;  %vm334_vm6 = vcmp.gt.f32.partialorder %v332_v28, 0.0 }
  0x17   : > { %v1833_v35 = vsel %vm335_vm3, 0.0, %v1732_v34  ;;  %v1837_v47 = vsel %vm334_vm6, 0.0, %v1732_v34  ;;  %vm1352_vm3 = vcmask 31744  }
  0x1a   : > { %1531 = vmatmul.mubr.msk.f32.vlgmr.msra.gmra.mrb[0].mxu1 %vm339_vm1, %v421_v8 }
  0xe5   : > { %v1525_v9 = vpop.f32.mrb[0].mxu0 }
  0xe6   : > { %628 = vperm.xlu1 %1646, %v1525_v9   ;;  %502 = vperm.xlu0 %1645, %v1525_v9   ;;  %v412_v10 = vpop.f32.mrb[1].mxu0 }
  0xe7   : > { %v1590_v11 = vpack.c.bf16 %v1525_v9, %v412_v10  ;;  %v1815_v12 = vpack.i.bf16 %v1525_v9, %v412_v10 }
  0xe9   : > { %1591 = vmatprep.subr.bf16.mxu0 %v1590_v11 }
  0xea   : > { %1647 = vset.pattern.permute.xlu1 %v1730_v13  ;;  %497 = vperm.xlu0 %1645, %v412_v10  }
  0xeb   : > { %1593 = vmatpush3.bf16.msra.mxu0 %v1590_v11  ;;  %759 = vperm.xlu1 %1647, %v1525_v9  }
  0xed   : > { %v1817_v14 = vpop.f32.mrb[0].mxu1 }
  0xee   : > { %1649 = vset.pattern.permute.xlu0 %v1730_v13  ;;  %v1532_v15 = vpop.f32.mrb[1].mxu1  ;;  %v634_v25 = vrot.slane %v1817_v14, %v633_v21  ;;  %v508_v26 = vrot.slane %v1817_v14, %v507_v22  ;;  %v765_v33 = vrot.slane %v1817_v14, %v764_v27  ;;  %v896_v63 = vrot.slane %v1817_v14, %v895_v52 }
  0xef   : > { %1648 = vset.pattern.permute.xlu1 %v1728_v3  ;;  %755 = vperm.xlu0 %1649, %v412_v10  }
  0xf0   : > { %624 = vperm.xlu1 %1648, %v412_v10  }
  0xf3   : > { %1651 = vset.pattern.permute.xlu0 %v1731_v16 }
  0xf4   : > { %1650 = vset.pattern.permute.xlu1 %v1731_v16  ;;  %890 = vperm.xlu0 %1651, %v1525_v9  }
  0xf5   : > { %886 = vperm.xlu1 %1650, %v412_v10  }
 0x165   : > { %v629_v29 = vpop.permute.xlu1 %628  ;;  %v503_v30 = vpop.permute.xlu0 %502 }
 0x166   : > { %v636_v31 = vadd.f32 %v634_v25, %v629_v29  ;;  %v510_v32 = vadd.f32 %v508_v26, %v503_v30 }
 0x168   : > { %vm638_vm4 = vcmp.gt.f32.partialorder %v636_v31, 0.0  ;;  %v640_v36 = vmul.f32 0.2, %v636_v31  ;;  %vm512_vm5 = vcmp.gt.f32.partialorder %v510_v32, 0.0  ;;  %v514_v37 = vmul.f32 0.2, %v510_v32 }
 0x169   : > { %v498_v38 = vpop.permute.xlu0 %497 }
 0x16a   : > { %v509_v39 = vadd.f32 %v508_v26, %v498_v38  ;;  %v760_v40 = vpop.permute.xlu1 %759  ;;  %v516_v41 = vsel %vm512_vm5, %v510_v32, %v514_v37  ;;  %v642_v42 = vsel %vm638_vm4, %v636_v31, %v640_v36 }
 0x16b   : > { %v767_v43 = vadd.f32 %v765_v33, %v760_v40  ;;  %v518_v44 = vadd.f32 %v516_v41, %v1833_v35  ;;  %v644_v46 = vadd.f32 %v642_v42, %v1833_v35 }
 0x16c   : > { %vm511_vm8 = vcmp.gt.f32.partialorder %v509_v39, 0.0  ;;  %v513_v45 = vmul.f32 0.2, %v509_v39 }
 0x16d   : > { %vm769_vm9 = vcmp.gt.f32.partialorder %v767_v43, 0.0  ;;  %v771_v48 = vmul.f32 0.2, %v767_v43  ;;  %v523_v49 = vsel %vm519_vm7, %v518_v44, -inf  ;;  %v648_v58 = vsel %vm519_vm7, %v644_v46, -inf }
 0x16e   : > { %v756_v50 = vpop.permute.xlu0 %755  ;;  %524 = vmax.xlane.f32.xlu0 %v523_v49  ;;  %v515_v51 = vsel %vm511_vm8, %v509_v39, %v513_v45 }
 0x16f   : > { %v766_v53 = vadd.f32 %v765_v33, %v756_v50  ;;  %v625_v54 = vpop.permute.xlu1 %624  ;;  %v517_v55 = vadd.f32 %v515_v51, %v1837_v47  ;;  %v773_v56 = vsel %vm769_vm9, %v767_v43, %v771_v48 }
 0x170   : > { %v635_v57 = vadd.f32 %v634_v25, %v625_v54  ;;  %v775_v61 = vadd.f32 %v773_v56, %v1833_v35 }
 0x171   : > { %vm768_vm10 = vcmp.gt.f32.partialorder %v766_v53, 0.0  ;;  %v770_v59 = vmul.f32 0.2, %v766_v53  ;;  %v520_v60 = vsel %vm519_vm7, %v517_v55, -inf }
 0x172   : > { %vm637_vm11 = vcmp.gt.f32.partialorder %v635_v57, 0.0  ;;  %v639_v62 = vmul.f32 0.2, %v635_v57  ;;  %649 = vmax.xlane.f32.xlu0 %v648_v58  ;;  %521 = vmax.xlane.f32.xlu1 %v520_v60  ;;  %v779_v8 = vsel %vm519_vm7, %v775_v61, -inf }
 0x173   : > { %v891_v0 = vpop.permute.xlu0 %890  ;;  %v772_v6 = vsel %vm768_vm10, %v766_v53, %v770_v59 }
 0x174   : > { %v898_v3 = vadd.f32 %v896_v63, %v891_v0  ;;  %v887_v4 = vpop.permute.xlu1 %886  ;;  %v641_v5 = vsel %vm637_vm11, %v635_v57, %v639_v62  ;;  %v774_v15 = vadd.f32 %v772_v6, %v1837_v47 }
 0x175   : > { %v897_v7 = vadd.f32 %v896_v63, %v887_v4  ;;  %v643_v9 = vadd.f32 %v641_v5, %v1837_v47 }
 0x176   : > { %vm900_vm12 = vcmp.gt.f32.partialorder %v898_v3, 0.0  ;;  %v902_v10 = vmul.f32 0.2, %v898_v3  ;;  %780 = vmax.xlane.f32.xlu0 %v779_v8  ;;  %v776_v20 = vsel %vm519_vm7, %v774_v15, -inf }
 0x177   : > { %vm899_vm13 = vcmp.gt.f32.partialorder %v897_v7, 0.0  ;;  %v901_v11 = vmul.f32 0.2, %v897_v7  ;;  %v645_v13 = vsel %vm519_vm7, %v643_v9, -inf }
 0x178   : > { %646 = vmax.xlane.f32.xlu1 %v645_v13  ;;  %v904_v14 = vsel %vm900_vm12, %v898_v3, %v902_v10 }
 0x179   : > { %v906_v16 = vadd.f32 %v904_v14, %v1833_v35  ;;  %v903_v17 = vsel %vm899_vm13, %v897_v7, %v901_v11 }
 0x17a   : > { %v905_v21 = vadd.f32 %v903_v17, %v1837_v47 }
 0x17b   : > { %v910_v18 = vsel %vm519_vm7, %v906_v16, -inf }
 0x17c   : > { %911 = vmax.xlane.f32.xlu0 %v910_v18  ;;  %777 = vmax.xlane.f32.xlu1 %v776_v20  ;;  %v907_v23 = vsel %vm519_vm7, %v905_v21, -inf }
 0x180   : > { %908 = vmax.xlane.f32.xlu1 %v907_v23 }
 0x191   : > { %1653 = vrot.lane.b32.xlu1 %v1815_v12, %s1733_s19 }
 0x1fb   : > { %v525_v24 = vpop.xlane.xlu0 %524 }
 0x1fc   : > { %v527_v25 = vsub.f32 %v518_v44, %v525_v24 }
 0x1fe   : > { %v530_v26 = vmul.f32 1.442695, %v527_v25 }
 0x1ff   : > { %v650_v27 = vpop.xlane.xlu0 %649  ;;  %v522_v28 = vpop.xlane.xlu1 %521 }
 0x200   : > { %1669 = vpow2.f32 %v530_v26  ;;  %v652_v29 = vsub.f32 %v644_v46, %v650_v27  ;;  %v526_v30 = vsub.f32 %v517_v55, %v522_v28 }
 0x202   : > { %v655_v31 = vmul.f32 1.442695, %v652_v29  ;;  %v528_v32 = vmul.f32 1.442695, %v526_v30 }
 0x203   : > { %v781_v33 = vpop.xlane.xlu0 %780 }
 0x204   : > { %1671 = vpow2.f32 %v655_v31  ;;  %v783_v34 = vsub.f32 %v775_v61, %v781_v33 }
 0x205   : > { %1673 = vpow2.f32 %v528_v32  ;;  %v647_v36 = vpop.xlane.xlu1 %646 }
 0x206   : > { %v786_v37 = vmul.f32 1.442695, %v783_v34  ;;  %v651_v38 = vsub.f32 %v643_v9, %v647_v36 }
 0x208   : > { %1675 = vpow2.f32 %v786_v37  ;;  %v653_v39 = vmul.f32 1.442695, %v651_v38 }
 0x209   : > { %v912_v40 = vpop.xlane.xlu0 %911  ;;  %v778_v41 = vpop.xlane.xlu1 %777 }
 0x20a   : > { %v1670_v42 = vpop.eup %1669  ;;  %1677 = vpow2.f32 %v653_v39  ;;  %v914_v43 = vsub.f32 %v906_v16, %v912_v40  ;;  %v782_v44 = vsub.f32 %v774_v15, %v778_v41 }
 0x20b   : > { %v535_v45 = vsel %vm519_vm7, %v1670_v42, 0.0 }
 0x20c   : > { %v917_v46 = vmul.f32 1.442695, %v914_v43  ;;  %v784_v48 = vmul.f32 1.442695, %v782_v44  ;;  %536 = vadd.xlane.f32.xlu0 %v535_v45  ;;  %v1058_v45 = vld [vmem:[%s1943_s5] sm:$0xff] }
 0x20d   : > { %v909_v49 = vpop.xlane.xlu1 %908 }
 0x20e   : > { %v1857_v50 = vpop.eup %1671  ;;  %1679 = vpow2.f32 %v917_v46  ;;  %v913_v51 = vsub.f32 %v905_v21, %v909_v49 }
 0x20f   : > { %v1674_v52 = vpop.eup %1673  ;;  %1681 = vpow2.f32 %v784_v48  ;;  %v660_v53 = vsel %vm519_vm7, %v1857_v50, 0.0 }
 0x210   : > { %v915_v54 = vmul.f32 1.442695, %v913_v51  ;;  %661 = vadd.xlane.f32.xlu0 %v660_v53  ;;  %v532_v55 = vsel %vm519_vm7, %v1674_v52, 0.0 }
 0x211   : > { %533 = vadd.xlane.f32.xlu1 %v532_v55  ;;  %v1654_v56 = vpop.permute.xlu1 %1653 }
 0x212   : > { %v1862_v57 = vpop.eup %1675  ;;  %1683 = vpow2.f32 %v915_v54  ;;  %v1656_v58 = vunpack.i.h.bf16 %v1654_v56  ;;  %v1655_v59 = vunpack.i.l.bf16 %v1654_v56  ;;  %v1739_v56 = vmov 4  }
 0x213   : > { %v791_v60 = vsel %vm519_vm7, %v1862_v57, 0.0  ;;  %1668 = vset.pattern.permute.xlu0 %v1739_v56  ;;  %1667 = vset.pattern.permute.xlu1 %v1739_v56 }
 0x214   : > { %v1678_v61 = vpop.eup %1677  ;;  %v1594_v62 = vpack.c.bf16 %v1656_v58, %v1655_v59  ;;  %792 = vadd.xlane.f32.xlu0 %v791_v60 }
 0x215   : > { %v657_v63 = vsel %vm519_vm7, %v1678_v61, 0.0 }
 0x216   : > { %658 = vadd.xlane.f32.xlu1 %v657_v63  ;;  %1595 = vmatprep.subr.bf16.mxu0 %v1594_v62  ;;  %v1468_v63 = vld [vmem:[%s1942_s4] ss:$0 sm:$0xff] }
 0x218   : > { %v1867_v0 = vpop.eup %1679 }
 0x219   : > { %v1682_v3 = vpop.eup %1681  ;;  %v922_v4 = vsel %vm519_vm7, %v1867_v0, 0.0 }
 0x21a   : > { %923 = vadd.xlane.f32.xlu0 %v922_v4  ;;  %v788_v5 = vsel %vm519_vm7, %v1682_v3, 0.0 }
 0x21b   : > { %789 = vadd.xlane.f32.xlu1 %v788_v5 }
 0x21c   : > { %v1684_v6 = vpop.eup %1683 }
 0x21d   : > { %v919_v7 = vsel %vm519_vm7, %v1684_v6, 0.0 }
 0x21f   : > { %920 = vadd.xlane.f32.xlu1 %v919_v7 }
 0x230   : > { %1663 = vrot.lane.b32.xlu1 %v1815_v12, %s1734_s20  ;;  %1658 = vrot.lane.b32.xlu0 %v1815_v12, %s1735_s21 }
 0x299   : > { %v537_v8 = vpop.xlane.xlu0 %536 }
 0x29a   : > { %1685 = vrcp.f32 %v537_v8 }
 0x29d   : > { %v662_v9 = vpop.xlane.xlu0 %661 }
 0x29e   : > { %v534_v10 = vpop.xlane.xlu1 %533 }
 0x29f   : > { %1687 = vrcp.f32 %v534_v10 }
 0x2a0   : > { %1689 = vrcp.f32 %v662_v9 }
 0x2a1   : > { %v793_v11 = vpop.xlane.xlu0 %792 }
 0x2a3   : > { %v659_v13 = vpop.xlane.xlu1 %658 }
 0x2a4   : > { %1691 = vrcp.f32 %v659_v13  ;;  %v1686_v14 = vpop.eup %1685 }
 0x2a5   : > { %1693 = vrcp.f32 %v793_v11  ;;  %v541_v20 = vmul.f32 %v1686_v14, %v1670_v42 }
 0x2a7   : > { %v924_v15 = vpop.xlane.xlu0 %923 }
 0x2a8   : > { %v790_v16 = vpop.xlane.xlu1 %789 }
 0x2a9   : > { %v1688_v17 = vpop.eup %1687  ;;  %1695 = vrcp.f32 %v790_v16 }
 0x2aa   : > { %v540_v18 = vmul.f32 %v1688_v17, %v1674_v52  ;;  %1697 = vrcp.f32 %v924_v15  ;;  %v1690_v25 = vpop.eup %1689  ;;  %v1144_v15 = vld [vmem:[%s1944_s6] sm:$0x1] }
 0x2ab   : > { %v1659_v21 = vpop.permute.xlu0 %1658  ;;  %v666_v29 = vmul.f32 %v1690_v25, %v1857_v50  ;;  %v1060_v50 = vld [vmem:[%s1943_s5 + $0x10] sm:$0xff] }
 0x2ac   : > { %v1661_v12 = vunpack.i.h.bf16 %v1659_v21  ;;  %v1660_v23 = vunpack.i.l.bf16 %v1659_v21  ;;  %1537 = vmatprep.mubr.msk.f32.mxu0 %vm519_vm7, %v540_v18  ;;  %v921_v24 = vpop.xlane.xlu1 %920 }
 0x2ad   : > { %1699 = vrcp.f32 %v921_v24  ;;  %1538 = vmatmul.mubr.msk.f32.vlgmr.msra.gmra.mrb[2].mxu0 %vm519_vm7, %v541_v20 }
 0x2ae   : > { %v1692_v26 = vpop.eup %1691  ;;  %v1598_v27 = vpack.c.bf16 %v1661_v12, %v1660_v23  ;;  %1597 = vmatpush3.bf16.msra.mxu0 %v1594_v62 }
 0x2af   : > { %v665_v28 = vmul.f32 %v1692_v26, %v1678_v61  ;;  %v1694_v33 = vpop.eup %1693 }
 0x2b0   : > { %v1664_v30 = vpop.permute.xlu1 %1663  ;;  %1599 = vmatprep.subr.bf16.mxu1 %v1598_v27  ;;  %v797_v38 = vmul.f32 %v1694_v33, %v1862_v57 }
 0x2b1   : > { %v1666_v31 = vunpack.i.h.bf16 %v1664_v30  ;;  %v1665_v32 = vunpack.i.l.bf16 %v1664_v30  ;;  %1544 = vmatprep.mubr.msk.f32.mxu0 %vm519_vm7, %v665_v28  ;;  %1601 = vmatpush3.bf16.msra.mxu1 %v1598_v27 }
 0x2b2   : > { %1545 = vmatmul.mubr.msk.f32.vlgmr.msra.gmra.mrb[4].mxu0 %vm519_vm7, %v666_v29 }
 0x2b3   : > { %v1696_v34 = vpop.eup %1695  ;;  %v1602_v36 = vpack.c.bf16 %v1666_v31, %v1665_v32 }
 0x2b4   : > { %v796_v37 = vmul.f32 %v1696_v34, %v1682_v3  ;;  %v1698_v39 = vpop.eup %1697 }
 0x2b5   : > { %1603 = vmatprep.subr.bf16.mxu0 %v1602_v36  ;;  %v928_v42 = vmul.f32 %v1698_v39, %v1867_v0 }
 0x2b6   : > { %1551 = vmatprep.mubr.msk.f32.mxu1 %vm519_vm7, %v796_v37  ;;  %1605 = vmatpush3.bf16.msra.mxu0 %v1602_v36 }
 0x2b7   : > { %v1700_v40 = vpop.eup %1699  ;;  %1552 = vmatmul.mubr.msk.f32.vlgmr.msra.gmra.mrb[2].mxu1 %vm519_vm7, %v797_v38  ;;  %1614 = vmatprep.subr.bf16.mxu0 %v1725_v1  ;;  %v1059_v1 = vld [vmem:[%s1943_s5 + $0x8] sm:$0xff] }
 0x2b8   : > { %v927_v41 = vmul.f32 %v1700_v40, %v1684_v6  ;;  %v1606_v46 = vpack.c.bf16 %v1059_v1, %v1058_v45 }
 0x2ba   : > { %1558 = vmatprep.mubr.msk.f32.mxu0 %vm519_vm7, %v927_v41  ;;  %1607 = vmatprep.subr.bf16.mxu1 %v1606_v46 }
 0x2bb   : > { %1559 = vmatmul.mubr.msk.f32.vlgmr.msra.gmra.mrb[6].mxu0 %vm519_vm7, %v928_v42  ;;  %1609 = vmatpush3.bf16.msra.mxu1 %v1606_v46  ;;  %v1474_v46 = vld [vmem:[%s1945_s7] ss:$0 sm:$0xff] }
 0x2bc   : > { %1576 = vmatprep.mubr.msk.f32.mxu0 %vm1726_vm0, %v1727_v2  ;;  %v1061_v2 = vld [vmem:[%s1943_s5 + $0x18] sm:$0xff]  ;;  %vm1616_vm0 = vmpackc.low %vm1062_vm15, %vm1062_vm15 }
 0x2bd   : > { %v1610_v51 = vpack.c.bf16 %v1061_v2, %v1060_v50 }
 0x2bf   : > { %1611 = vmatprep.subr.bf16.mxu1 %v1610_v51 }
 0x2c0   : > { %1613 = vmatpush3.bf16.msra.mxu1 %v1610_v51 }
 0x380   : > { %v1539_v43 = vpop.f32.mrb[2].mxu0 }
 0x381   : > { %v614_v44 = vpop.f32.mrb[3].mxu0 }
 0x385   : > { %v1546_v48 = vpop.f32.mrb[4].mxu0 }
 0x386   : > { %v745_v49 = vpop.f32.mrb[5].mxu0 }
 0x38a   : > { %v1553_v52 = vpop.f32.mrb[2].mxu1 }
 0x38b   : > { %1028 = vrot.lane.b32.xlu0 %v1553_v52, %s1736_s11  ;;  %v876_v53 = vpop.f32.mrb[3].mxu1 }
 0x38c   : > { %1026 = vrot.lane.b32.xlu1 %v876_v53, %s1736_s11 }
 0x38e   : > { %v1560_v54 = vpop.f32.mrb[6].mxu0 }
 0x38f   : > { %1020 = vrot.lane.b32.xlu0 %v1546_v48, %s1737_s12  ;;  %v1007_v55 = vpop.f32.mrb[7].mxu0 }
 0x390   : > { %1018 = vrot.lane.b32.xlu1 %v745_v49, %s1737_s12 }
 0x393   : > { %1036 = vrot.lane.b32.xlu0 %v1560_v54, %s1738_s13 }
 0x394   : > { %1034 = vrot.lane.b32.xlu1 %v1007_v55, %s1738_s13 }
 0x3fd   : > { %v1029_v57 = vpop.permute.xlu0 %1028 }
 0x3fe   : > { %v1027_v58 = vpop.permute.xlu1 %1026 }
 0x401   : > { %v1021_v59 = vpop.permute.xlu0 %1020 }
 0x402   : > { %v1041_v60 = vsel %vm339_vm1, %v1539_v43, %v1021_v59  ;;  %v1019_v61 = vpop.permute.xlu1 %1018 }
 0x403   : > { %v1040_v62 = vsel %vm339_vm1, %v614_v44, %v1019_v61  ;;  %v1043_v0 = vsel %vm519_vm7, %v1041_v60, %v1029_v57 }
 0x404   : > { %v1042_v5 = vsel %vm519_vm7, %v1040_v62, %v1027_v58 }
 0x405   : > { %v1037_v3 = vpop.permute.xlu0 %1036 }
 0x406   : > { %v1046_v4 = vsel %vm1044_vm14, %v1043_v0, %v1037_v3  ;;  %v1035_v6 = vpop.permute.xlu1 %1034 }
 0x407   : > { %v1055_v7 = vadd.f32 %v1468_v63, %v1046_v4  ;;  %v1045_v8 = vsel %vm1044_vm14, %v1042_v5, %v1035_v6 }
 0x408   : > { %v1054_v9 = vadd.f32 %v1468_v63, %v1045_v8 }
 0x409   : > { %v1057_v10 = vmax.f32 %v1055_v7, 0.0 }
 0x40a   : > { %v1056_v11 = vmax.f32 %v1054_v9, 0.0 }
 0x40c   : > { %v1615_v13 = vpack.c.bf16 %v1057_v10, %v1056_v11  ;;  %1569 = vmatprep.mubr.msk.f32.mxu1 %vm1062_vm15, %v1056_v11 }
 0x40d   : > { %1570 = vmatmul.mubr.msk.f32.vlgmr.msra.gmra.mrb[4].mxu1 %vm1062_vm15, %v1057_v10 }
 0x40e   : > { %1617 = vmatpush3.bf16.xpose.msk.msra.mxu0 %vm1616_vm0, %v1615_v13 }
 0x415   : > { %1577 = vmatmul.mubr.msk.f32.vlgmr.msra.gmra.mrb[8].mxu0 %vm1062_vm15, %v1144_v15 }
 0x4e0   : > { %v1571_v14 = vpop.f32.mrb[4].mxu1 }
 0x4e1   : > { %1225 = vperm.xlu0 %1668, %v1571_v14   ;;  %v1135_v16 = vpop.f32.mrb[5].mxu1 }
 0x4e2   : > { %v1618_v17 = vpack.c.bf16 %v1571_v14, %v1135_v16  ;;  %1220 = vperm.xlu1 %1667, %v1135_v16  }
 0x4e4   : > { %1619 = vmatprep.subr.bf16.mxu1 %v1618_v17 }
 0x4e5   : > { %1621 = vmatpush3.bf16.msra.mxu1 %v1618_v17 }
 0x4e8   : > { %v1214_v18 = vpop.f32.mrb[8].mxu0 }
 0x4e9   : > { %v1578_v20 = vpop.f32.mrb[9].mxu0  ;;  %v1231_v21 = vrot.slane %v1214_v18, %v507_v22 }
 0x560   : > { %v1226_v12 = vpop.permute.xlu0 %1225 }
 0x561   : > { %v1233_v23 = vadd.f32 %v1231_v21, %v1226_v12  ;;  %v1221_v24 = vpop.permute.xlu1 %1220 }
 0x562   : > { %v1232_v25 = vadd.f32 %v1231_v21, %v1221_v24 }
 0x563   : > { %vm1235_vm1 = vcmp.gt.f32.partialorder %v1233_v23, 0.0  ;;  %v1237_v26 = vmul.f32 0.2, %v1233_v23 }
 0x564   : > { %vm1234_vm2 = vcmp.gt.f32.partialorder %v1232_v25, 0.0  ;;  %v1236_v27 = vmul.f32 0.2, %v1232_v25 }
 0x565   : > { %v1239_v28 = vsel %vm1235_vm1, %v1233_v23, %v1237_v26 }
 0x566   : > { %v1241_v29 = vadd.f32 %v1239_v28, %v1833_v35  ;;  %v1238_v30 = vsel %vm1234_vm2, %v1232_v25, %v1236_v27 }
 0x567   : > { %v1240_v31 = vadd.f32 %v1238_v30, %v1837_v47 }
 0x568   : > { %v1245_v32 = vsel %vm519_vm7, %v1241_v29, -inf }
 0x569   : > { %1246 = vmax.xlane.f32.xlu0 %v1245_v32  ;;  %v1242_v19 = vsel %vm519_vm7, %v1240_v31, -inf }
 0x56a   : > { %1243 = vmax.xlane.f32.xlu1 %v1242_v19 }
 0x5f6   : > { %v1247_v22 = vpop.xlane.xlu0 %1246 }
 0x5f7   : > { %v1249_v33 = vsub.f32 %v1241_v29, %v1247_v22  ;;  %v1244_v34 = vpop.xlane.xlu1 %1243 }
 0x5f8   : > { %v1248_v36 = vsub.f32 %v1240_v31, %v1244_v34 }
 0x5f9   : > { %v1252_v37 = vmul.f32 1.442695, %v1249_v33 }
 0x5fa   : > { %v1250_v38 = vmul.f32 1.442695, %v1248_v36 }
 0x5fb   : > { %1701 = vpow2.f32 %v1252_v37 }
 0x5fc   : > { %1703 = vpow2.f32 %v1250_v38 }
 0x605   : > { %v1702_v39 = vpop.eup %1701 }
 0x606   : > { %v1704_v40 = vpop.eup %1703  ;;  %v1257_v35 = vsel %vm519_vm7, %v1702_v39, 0.0 }
 0x607   : > { %1258 = vadd.xlane.f32.xlu0 %v1257_v35  ;;  %v1254_v47 = vsel %vm519_vm7, %v1704_v40, 0.0 }
 0x608   : > { %1255 = vadd.xlane.f32.xlu1 %v1254_v47 }
 0x694   : > { %v1259_v41 = vpop.xlane.xlu0 %1258 }
 0x695   : > { %1705 = vrcp.f32 %v1259_v41  ;;  %v1256_v42 = vpop.xlane.xlu1 %1255 }
 0x696   : > { %1707 = vrcp.f32 %v1256_v42 }
 0x69f   : > { %v1706_v43 = vpop.eup %1705 }
 0x6a0   : > { %v1708_v44 = vpop.eup %1707  ;;  %v1263_v1 = vmul.f32 %v1706_v43, %v1702_v39 }
 0x6a1   : > { %v1262_v45 = vmul.f32 %v1708_v44, %v1704_v40 }
 0x6a3   : > { %1583 = vmatprep.mubr.msk.f32.mxu1 %vm519_vm7, %v1262_v45 }
 0x6a4   : > { %1584 = vmatmul.mubr.msk.f32.vlgmr.msra.gmra.mrb[6].mxu1 %vm519_vm7, %v1263_v1 }
 0x777   : > { %v1585_v48 = vpop.f32.mrb[6].mxu1 }
 0x778   : > { %v1349_v49 = vadd.f32 %v1585_v48, %v1474_v46  ;;  %v1343_v50 = vpop.f32.mrb[7].mxu1 }
 0x779   : > { %v1344_v2 = vadd.f32 %v1474_v46, %v1343_v50 }
 0x77a   : > { %v1356_v51 = vsel %vm1352_vm3, %v1349_v49, -inf }
 0x77b   : > { %1357 = vmax.xlane.f32.xlu0 %v1356_v51  ;;  %v1353_v52 = vsel %vm1352_vm3, %v1344_v2, -inf }
 0x77c   : > { %1354 = vmax.xlane.f32.xlu1 %v1353_v52 }
 0x808   : > { %v1358_v53 = vpop.xlane.xlu0 %1357 }
 0x809   : > { %v1360_v54 = vsub.f32 %v1349_v49, %v1358_v53  ;;  %v1355_v55 = vpop.xlane.xlu1 %1354 }
 0x80a   : > { %v1359_v56 = vsub.f32 %v1344_v2, %v1355_v55 }
 0x80b   : > { %v1363_v57 = vmul.f32 1.442695, %v1360_v54 }
 0x80c   : > { %v1361_v58 = vmul.f32 1.442695, %v1359_v56 }
 0x80d   : > { %1709 = vpow2.f32 %v1363_v57 }
 0x80e   : > { %1711 = vpow2.f32 %v1361_v58 }
 0x817   : > { %v1710_v59 = vpop.eup %1709 }
 0x818   : > { %v1712_v60 = vpop.eup %1711  ;;  %v1368_v61 = vsel %vm1352_vm3, %v1710_v59, 0.0 }
 0x819   : > { %1369 = vadd.xlane.f32.xlu0 %v1368_v61  ;;  %v1365_v62 = vsel %vm1352_vm3, %v1712_v60, 0.0 }
 0x81a   : > { %1366 = vadd.xlane.f32.xlu1 %v1365_v62 }
 0x8a6   : > { %v1370_v63 = vpop.xlane.xlu0 %1369 }
 0x8a7   : > { %1713 = vrcp.f32 %v1370_v63  ;;  %v1367_v0 = vpop.xlane.xlu1 %1366 }
 0x8a8   : > { %1715 = vrcp.f32 %v1367_v0 }
 0x8b1   : > { %v1714_v3 = vpop.eup %1713 }
 0x8b2   : > { %v1716_v4 = vpop.eup %1715  ;;  %v1374_v5 = vmul.f32 %v1714_v3, %v1710_v59 }
 0x8b3   : > { %v1373_v6 = vmul.f32 %v1716_v4, %v1712_v60 }
 0x8b4   : > { %1376 = vst.msk [vmem:[%s325_s22 + $0x8] sm:$0xff] %vm1352_vm3, %v1374_v5 }
 0x8b5   : > { %1375 = vst.msk [vmem:[%s325_s22] sm:$0xff] %vm1352_vm3, %v1373_v6 }
 0x8b6 PF: > { %s18_s27 = sadd.s32 1, %s1723_s27  }
 0x8b7   : > { %p15_p4 = scmp.ge.s32.totalorder %s18_s27, 6  }
 0x8b9   :  { %17 = sbr.rel (!%p15_p4) target bundleno = 1 (0x1), region = 85 }

</bundles_post_ra>
